<compile_context>
chip_gen: v6e
topology: v6e:2x2x1
jax: 0.10.0
libtpu: 0.0.40
codegen_flags: <defaults>
</compile_context>

<pallas_src>
import functools

import jax
import jax.numpy as jnp
from jax.experimental import pallas as pl
from jax.experimental.pallas import tpu as pltpu

_LANES = 128
_SUBLANES = 8


def _round_up(x, m):
    return -(-x // m) * m


def _vmem_capacity_bytes():
    """Physical VMEM for this chip (conservative fallback if query fails)."""
    try:
        return int(pltpu.get_tpu_info().vmem_capacity_bytes)
    except Exception:  # pragma: no cover - e.g. interpret mode / older runtime
        return 64 * 1024 * 1024  # v7x-sized (smallest of v5e/v6e/v7x)


def _choose_block_rows(n, d, itemsize, vmem_cap):
    """Row-tile size: VMEM-safe, pipelined (~8 steps), bandwidth-friendly."""
    n_padded = _round_up(n, _SUBLANES)

    # Hard ceiling: 3 input streams x 2 pipeline buffers within half of VMEM.
    per_row_bytes = 3 * 2 * d * itemsize
    max_rows = max((vmem_cap // 2) // per_row_bytes, _SUBLANES)
    max_rows = (max_rows // _SUBLANES) * _SUBLANES

    # Target ~8 grid steps so DMA/compute overlap and cores can share work...
    rows_8_blocks = _round_up(max(-(-n_padded // 8), _SUBLANES), _SUBLANES)
    # ...but don't shrink below ~1 MiB per stream when N affords >= 4 blocks.
    rows_1mib = _round_up(max(-(-(1 << 20) // (d * itemsize)), _SUBLANES),
                          _SUBLANES)
    if n_padded >= 4 * rows_1mib:
        block_rows = max(rows_8_blocks, rows_1mib)
    else:
        block_rows = rows_8_blocks

    return int(max(_SUBLANES, min(block_rows, max_rows, n_padded)))


def _triplet_kernel(margin_ref, pos_ref, neg_ref, w_ref,
                    loss_out_ref, w_out_ref, *, n_rows, block_rows, needs_mask):
    margin = margin_ref[0]

    # Stream the native dtype; upcast to f32 immediately after the loads so
    # all arithmetic / partial sums are f32 (mandatory on v5e: no bf16 VPU).
    pos = pos_ref[...].astype(jnp.float32)
    neg = neg_ref[...].astype(jnp.float32)
    w = w_ref[...].astype(jnp.float32)

    hinge = jnp.maximum(neg - pos + margin, 0.0)
    weighted = hinge * w

    def _write(weighted_v, w_v):
        # Lane-dense (1, 8, 128) partial blocks -> unmasked vector stores.
        loss_out_ref[...] = jnp.full(loss_out_ref.shape, jnp.sum(weighted_v),
                                     jnp.float32)
        w_out_ref[...] = jnp.full(w_out_ref.shape, jnp.sum(w_v), jnp.float32)

    if needs_mask:
        # Only the last tile can contain out-of-bounds rows; gate the mask so
        # every other step stays at the minimal 4-VPU-op steady state.
        i = pl.program_id(0)
        last = pl.num_programs(0) - 1

        @pl.when(i != last)
        def _():
            _write(weighted, w)

        @pl.when(i == last)
        def _():
            row_ids = jax.lax.broadcasted_iota(jnp.int32, (block_rows, 1), 0)
            valid = (i * block_rows + row_ids) < n_rows
            _write(jnp.where(valid, weighted, 0.0), jnp.where(valid, w, 0.0))
    else:
        _write(weighted, w)


# Cache of the dimension_semantics that lowered successfully on this chip.
_PREFERRED_DIMSEM = None


def triplet_loss_cb(pos_samp, neg_samp, weights, margin, *, block_rows=None):
    """Pallas implementation of TripletLoss_CB.forward. Returns a scalar."""
    global _PREFERRED_DIMSEM

    n, d = pos_samp.shape
    assert neg_samp.shape == (n, d) and weights.shape == (n, d)

    # No wrapper casts: inputs are streamed in their native dtype.
    itemsize = max(jnp.dtype(a.dtype).itemsize
                   for a in (pos_samp, neg_samp, weights))

    vmem_cap = _vmem_capacity_bytes()
    if block_rows is None:
        block_rows = _choose_block_rows(n, d, itemsize, vmem_cap)
    num_blocks = int(-(-n // block_rows))
    needs_mask = (n % block_rows) != 0

    margin_arr = jnp.asarray([margin], dtype=jnp.float32)

    kernel = functools.partial(
        _triplet_kernel, n_rows=n, block_rows=block_rows, needs_mask=needs_mask)

    in_bytes = sum(n * d * jnp.dtype(a.dtype).itemsize
                   for a in (pos_samp, neg_samp, weights))
    out_bytes = 2 * num_blocks * _SUBLANES * _LANES * 4
    cost = pl.CostEstimate(
        flops=6 * n * d,
        transcendentals=0,
        bytes_accessed=in_bytes + out_bytes,
    )

    # Scoped VMEM limit: headroom above the double-buffered working set while
    # staying well under physical capacity (important on v7x's 64 MiB).
    vmem_limit = int(min(vmem_cap * 3 // 4, 100 * 1024 * 1024))

    def _call(dim_sem):
        return pl.pallas_call(
            kernel,
            out_shape=(
                jax.ShapeDtypeStruct((num_blocks, _SUBLANES, _LANES), jnp.float32),
                jax.ShapeDtypeStruct((num_blocks, _SUBLANES, _LANES), jnp.float32),
            ),
            grid_spec=pltpu.PrefetchScalarGridSpec(
                num_scalar_prefetch=0,
                grid=(num_blocks,),
                in_specs=[
                    pl.BlockSpec(memory_space=pltpu.MemorySpace.SMEM),  # margin
                    pl.BlockSpec((block_rows, d), lambda i: (i, 0)),    # pos
                    pl.BlockSpec((block_rows, d), lambda i: (i, 0)),    # neg
                    pl.BlockSpec((block_rows, d), lambda i: (i, 0)),    # weights
                ],
                out_specs=[
                    pl.BlockSpec((1, _SUBLANES, _LANES), lambda i: (i, 0, 0)),
                    pl.BlockSpec((1, _SUBLANES, _LANES), lambda i: (i, 0, 0)),
                ],
            ),
            compiler_params=pltpu.CompilerParams(
                dimension_semantics=dim_sem,
                vmem_limit_bytes=vmem_limit,
            ),
            cost_estimate=cost,
        )(margin_arr, pos_samp, neg_samp, weights)

    # Prefer CORE_PARALLEL (splits independent row tiles across v7x's two
    # TensorCores); fall back to PARALLEL if this chip/runtime rejects it.
    candidates = []
    if _PREFERRED_DIMSEM is not None:
        candidates.append(_PREFERRED_DIMSEM)
    core_parallel = getattr(pltpu, "CORE_PARALLEL", None)
    if core_parallel is not None:
        candidates.append((core_parallel,))
    candidates.append((getattr(pltpu, "PARALLEL", "parallel"),))

    out_loss = out_w = None
    last_err = None
    for dim_sem in candidates:
        try:
            out_loss, out_w = _call(dim_sem)
            _PREFERRED_DIMSEM = dim_sem
            break
        except Exception as e:  # unsupported semantics on this chip -> fallback
            last_err = e
    if out_loss is None:
        raise last_err

    # Tiny final combine in plain JAX:  mean(dim=1).sum()/w_sum == (sum/D)/w_sum
    loss_sum = out_loss[:, 0, 0].sum()
    w_sum = out_w[:, 0, 0].sum()
    return (loss_sum / jnp.float32(d)) / w_sum


def triplet_loss_cb_ref(pos_samp, neg_samp, weights, margin):
    """Plain-JAX reference matching the PyTorch module exactly (f32 math)."""
    pos = pos_samp.astype(jnp.float32)
    neg = neg_samp.astype(jnp.float32)
    w = weights.astype(jnp.float32)
    weights_sum = w.sum()
    hinge = jnp.maximum(neg - pos + margin, 0.0) * w
    return hinge.mean(axis=1).sum() / weights_sum


if __name__ == "__main__":
    margin = 0.3
    key = jax.random.PRNGKey(0)

    def run_case(case_key, n, d, dtype, rtol=1e-5, atol=1e-6):
        k1, k2, k3 = jax.random.split(case_key, 3)
        pos = jax.random.normal(k1, (n, d), dtype=jnp.float32).astype(dtype)
        neg = jax.random.normal(k2, (n, d), dtype=jnp.float32).astype(dtype)
        w = jax.random.uniform(k3, (n, d), dtype=jnp.float32,
                               minval=0.1, maxval=1.0).astype(dtype)
        got = jax.block_until_ready(triplet_loss_cb(pos, neg, w, margin))
        want = triplet_loss_cb_ref(pos, neg, w, margin)
        assert jnp.allclose(got, want, rtol=rtol, atol=atol), \
            (n, d, dtype, got, want)

    keys = jax.random.split(key, 4)
    run_case(keys[0], 16, 128, jnp.float32)                           # aligned, 2 blocks
    run_case(keys[1], 20, 256, jnp.float32)                           # ragged N -> tail mask
    run_case(keys[2], 24, 128, jnp.bfloat16, rtol=1e-4, atol=1e-5)    # native bf16 streaming
    run_case(keys[3], 12, 200, jnp.float32)                           # ragged D (lane padding)

    print("KERNEL_OK")
</pallas_src>

<mosaic_0001>
module attributes {stable_mosaic.version = 11 : i64} {
  func.func @_triplet_kernel(%arg0: i32, %arg1: memref<1xf32, #tpu.memory_space<smem>>, %arg2: memref<8x128xf32, #tpu.memory_space<vmem>>, %arg3: memref<8x128xf32, #tpu.memory_space<vmem>>, %arg4: memref<8x128xf32, #tpu.memory_space<vmem>>, %arg5: memref<1x8x128xf32, #tpu.memory_space<vmem>>, %arg6: memref<1x8x128xf32, #tpu.memory_space<vmem>>) attributes {dimension_semantics = [#tpu.dimension_semantics<core_parallel>], iteration_bounds = array<i64: 2>, scalar_prefetch = 0 : i64, scratch_operands = 0 : i64, tpu.core_type = #tpu.core_type<tc>, window_params = [{transform_indices = @transform_0, window_bounds = array<i64: 1>}, {transform_indices = @transform_1, window_bounds = array<i64: 8, 128>}, {transform_indices = @transform_2, window_bounds = array<i64: 8, 128>}, {transform_indices = @transform_3, window_bounds = array<i64: 8, 128>}, {transform_indices = @transform_4, window_bounds = array<i64: 1, 8, 128>}, {transform_indices = @transform_5, window_bounds = array<i64: 1, 8, 128>}]} {
    %c0 = arith.constant 0 : index
    %0 = memref.load %arg1[%c0] : memref<1xf32, #tpu.memory_space<smem>>
    %c0_0 = arith.constant 0 : index
    %c0_1 = arith.constant 0 : index
    %1 = vector.load %arg2[%c0_0, %c0_1] : memref<8x128xf32, #tpu.memory_space<vmem>>, vector<8x128xf32>
    %c0_2 = arith.constant 0 : index
    %c0_3 = arith.constant 0 : index
    %2 = vector.load %arg3[%c0_2, %c0_3] : memref<8x128xf32, #tpu.memory_space<vmem>>, vector<8x128xf32>
    %c0_4 = arith.constant 0 : index
    %c0_5 = arith.constant 0 : index
    %3 = vector.load %arg4[%c0_4, %c0_5] : memref<8x128xf32, #tpu.memory_space<vmem>>, vector<8x128xf32>
    %4 = arith.subf %2, %1 : vector<8x128xf32>
    %5 = vector.broadcast %0 : f32 to vector<8x128xf32>
    %6 = arith.addf %4, %5 : vector<8x128xf32>
    %cst = arith.constant 0.000000e+00 : f32
    %7 = vector.broadcast %cst : f32 to vector<8x128xf32>
    %8 = arith.maximumf %6, %7 : vector<8x128xf32>
    %9 = arith.mulf %8, %3 : vector<8x128xf32>
    %10 = vector.shape_cast %9 : vector<8x128xf32> to vector<1x8x128xf32>
    %cst_6 = arith.constant dense<0.000000e+00> : vector<1xf32>
    %11 = vector.multi_reduction <add>, %10, %cst_6 [1, 2] : vector<1x8x128xf32> to vector<1xf32>
    %12 = vector.shape_cast %11 : vector<1xf32> to vector<1x1x1xf32>
    %13 = vector.extract %12[0, 0, 0] : f32 from vector<1x1x1xf32>
    %14 = vector.broadcast %13 : f32 to vector<1x8x128xf32>
    %c0_7 = arith.constant 0 : index
    %c0_8 = arith.constant 0 : index
    %c0_9 = arith.constant 0 : index
    %15 = vector.load %arg5[%c0_7, %c0_8, %c0_9] : memref<1x8x128xf32, #tpu.memory_space<vmem>>, vector<1x8x128xf32>
    tpu.vector_store %arg5[%c0_7, %c0_8, %c0_9], %14 {strides = array<i32>} : memref<1x8x128xf32, #tpu.memory_space<vmem>>, vector<1x8x128xf32>,
    %16 = vector.shape_cast %3 : vector<8x128xf32> to vector<1x8x128xf32>
    %cst_10 = arith.constant dense<0.000000e+00> : vector<1xf32>
    %17 = vector.multi_reduction <add>, %16, %cst_10 [1, 2] : vector<1x8x128xf32> to vector<1xf32>
    %18 = vector.shape_cast %17 : vector<1xf32> to vector<1x1x1xf32>
    %19 = vector.extract %18[0, 0, 0] : f32 from vector<1x1x1xf32>
    %20 = vector.broadcast %19 : f32 to vector<1x8x128xf32>
    %c0_11 = arith.constant 0 : index
    %c0_12 = arith.constant 0 : index
    %c0_13 = arith.constant 0 : index
    %21 = vector.load %arg6[%c0_11, %c0_12, %c0_13] : memref<1x8x128xf32, #tpu.memory_space<vmem>>, vector<1x8x128xf32>
    tpu.vector_store %arg6[%c0_11, %c0_12, %c0_13], %20 {strides = array<i32>} : memref<1x8x128xf32, #tpu.memory_space<vmem>>, vector<1x8x128xf32>,
    return
  }
  func.func @transform_0(%arg0: i32) -> i32 {
    %c0_i32 = arith.constant 0 : i32
    %c0_i32_0 = arith.constant 0 : i32
    return %c0_i32 : i32
  }
  func.func @transform_1(%arg0: i32) -> (i32, i32) {
    %c0_i32 = arith.constant 0 : i32
    %c0_i32_0 = arith.constant 0 : i32
    return %arg0, %c0_i32 : i32, i32
  }
  func.func @transform_2(%arg0: i32) -> (i32, i32) {
    %c0_i32 = arith.constant 0 : i32
    %c0_i32_0 = arith.constant 0 : i32
    return %arg0, %c0_i32 : i32, i32
  }
  func.func @transform_3(%arg0: i32) -> (i32, i32) {
    %c0_i32 = arith.constant 0 : i32
    %c0_i32_0 = arith.constant 0 : i32
    return %arg0, %c0_i32 : i32, i32
  }
  func.func @transform_4(%arg0: i32) -> (i32, i32, i32) {
    %c0_i32 = arith.constant 0 : i32
    %c0_i32_0 = arith.constant 0 : i32
    %c0_i32_1 = arith.constant 0 : i32
    return %arg0, %c0_i32, %c0_i32_0 : i32, i32, i32
  }
  func.func @transform_5(%arg0: i32) -> (i32, i32, i32) {
    %c0_i32 = arith.constant 0 : i32
    %c0_i32_0 = arith.constant 0 : i32
    %c0_i32_1 = arith.constant 0 : i32
    return %arg0, %c0_i32, %c0_i32_0 : i32, i32, i32
  }
}

module attributes {stable_mosaic.version = 11 : i64} {
  func.func @_triplet_kernel(%arg0: i32, %arg1: memref<1xf32, #tpu.memory_space<smem>>, %arg2: memref<8x128xf32, #tpu.memory_space<vmem>>, %arg3: memref<8x128xf32, #tpu.memory_space<vmem>>, %arg4: memref<8x128xf32, #tpu.memory_space<vmem>>, %arg5: memref<1x8x128xf32, #tpu.memory_space<vmem>>, %arg6: memref<1x8x128xf32, #tpu.memory_space<vmem>>) attributes {dimension_semantics = [#tpu.dimension_semantics<parallel>], iteration_bounds = array<i64: 2>, scalar_prefetch = 0 : i64, scratch_operands = 0 : i64, tpu.core_type = #tpu.core_type<tc>, window_params = [{transform_indices = @transform_0, window_bounds = array<i64: 1>}, {transform_indices = @transform_1, window_bounds = array<i64: 8, 128>}, {transform_indices = @transform_2, window_bounds = array<i64: 8, 128>}, {transform_indices = @transform_3, window_bounds = array<i64: 8, 128>}, {transform_indices = @transform_4, window_bounds = array<i64: 1, 8, 128>}, {transform_indices = @transform_5, window_bounds = array<i64: 1, 8, 128>}]} {
    %c0 = arith.constant 0 : index
    %0 = memref.load %arg1[%c0] : memref<1xf32, #tpu.memory_space<smem>>
    %c0_0 = arith.constant 0 : index
    %c0_1 = arith.constant 0 : index
    %1 = vector.load %arg2[%c0_0, %c0_1] : memref<8x128xf32, #tpu.memory_space<vmem>>, vector<8x128xf32>
    %c0_2 = arith.constant 0 : index
    %c0_3 = arith.constant 0 : index
    %2 = vector.load %arg3[%c0_2, %c0_3] : memref<8x128xf32, #tpu.memory_space<vmem>>, vector<8x128xf32>
    %c0_4 = arith.constant 0 : index
    %c0_5 = arith.constant 0 : index
    %3 = vector.load %arg4[%c0_4, %c0_5] : memref<8x128xf32, #tpu.memory_space<vmem>>, vector<8x128xf32>
    %4 = arith.subf %2, %1 : vector<8x128xf32>
    %5 = vector.broadcast %0 : f32 to vector<8x128xf32>
    %6 = arith.addf %4, %5 : vector<8x128xf32>
    %cst = arith.constant 0.000000e+00 : f32
    %7 = vector.broadcast %cst : f32 to vector<8x128xf32>
    %8 = arith.maximumf %6, %7 : vector<8x128xf32>
    %9 = arith.mulf %8, %3 : vector<8x128xf32>
    %10 = vector.shape_cast %9 : vector<8x128xf32> to vector<1x8x128xf32>
    %cst_6 = arith.constant dense<0.000000e+00> : vector<1xf32>
    %11 = vector.multi_reduction <add>, %10, %cst_6 [1, 2] : vector<1x8x128xf32> to vector<1xf32>
    %12 = vector.shape_cast %11 : vector<1xf32> to vector<1x1x1xf32>
    %13 = vector.extract %12[0, 0, 0] : f32 from vector<1x1x1xf32>
    %14 = vector.broadcast %13 : f32 to vector<1x8x128xf32>
    %c0_7 = arith.constant 0 : index
    %c0_8 = arith.constant 0 : index
    %c0_9 = arith.constant 0 : index
    %15 = vector.load %arg5[%c0_7, %c0_8, %c0_9] : memref<1x8x128xf32, #tpu.memory_space<vmem>>, vector<1x8x128xf32>
    tpu.vector_store %arg5[%c0_7, %c0_8, %c0_9], %14 {strides = array<i32>} : memref<1x8x128xf32, #tpu.memory_space<vmem>>, vector<1x8x128xf32>,
    %16 = vector.shape_cast %3 : vector<8x128xf32> to vector<1x8x128xf32>
    %cst_10 = arith.constant dense<0.000000e+00> : vector<1xf32>
    %17 = vector.multi_reduction <add>, %16, %cst_10 [1, 2] : vector<1x8x128xf32> to vector<1xf32>
    %18 = vector.shape_cast %17 : vector<1xf32> to vector<1x1x1xf32>
    %19 = vector.extract %18[0, 0, 0] : f32 from vector<1x1x1xf32>
    %20 = vector.broadcast %19 : f32 to vector<1x8x128xf32>
    %c0_11 = arith.constant 0 : index
    %c0_12 = arith.constant 0 : index
    %c0_13 = arith.constant 0 : index
    %21 = vector.load %arg6[%c0_11, %c0_12, %c0_13] : memref<1x8x128xf32, #tpu.memory_space<vmem>>, vector<1x8x128xf32>
    tpu.vector_store %arg6[%c0_11, %c0_12, %c0_13], %20 {strides = array<i32>} : memref<1x8x128xf32, #tpu.memory_space<vmem>>, vector<1x8x128xf32>,
    return
  }
  func.func @transform_0(%arg0: i32) -> i32 {
    %c0_i32 = arith.constant 0 : i32
    %c0_i32_0 = arith.constant 0 : i32
    return %c0_i32 : i32
  }
  func.func @transform_1(%arg0: i32) -> (i32, i32) {
    %c0_i32 = arith.constant 0 : i32
    %c0_i32_0 = arith.constant 0 : i32
    return %arg0, %c0_i32 : i32, i32
  }
  func.func @transform_2(%arg0: i32) -> (i32, i32) {
    %c0_i32 = arith.constant 0 : i32
    %c0_i32_0 = arith.constant 0 : i32
    return %arg0, %c0_i32 : i32, i32
  }
  func.func @transform_3(%arg0: i32) -> (i32, i32) {
    %c0_i32 = arith.constant 0 : i32
    %c0_i32_0 = arith.constant 0 : i32
    return %arg0, %c0_i32 : i32, i32
  }
  func.func @transform_4(%arg0: i32) -> (i32, i32, i32) {
    %c0_i32 = arith.constant 0 : i32
    %c0_i32_0 = arith.constant 0 : i32
    %c0_i32_1 = arith.constant 0 : i32
    return %arg0, %c0_i32, %c0_i32_0 : i32, i32, i32
  }
  func.func @transform_5(%arg0: i32) -> (i32, i32, i32) {
    %c0_i32 = arith.constant 0 : i32
    %c0_i32_0 = arith.constant 0 : i32
    %c0_i32_1 = arith.constant 0 : i32
    return %arg0, %c0_i32, %c0_i32_0 : i32, i32, i32
  }
}

</mosaic_0001>

<bundles_post_ra>
// kernel: tpu_custom_call.1
= control target key start
LH: loop header
LB: loop body
LE: loop exit
PB: predicated region body
PF: predicated region fallthrough
CT: control target
= control target key end

     0   :  { %s1089_s0 = inlined_call_operand.<no memory space> [shape: f32[1], index: 0, kind: input, shape index: {}]   ;;  %s1090_s1 = inlined_call_operand.hbm [shape: f32[16,128], index: 1, kind: input, shape index: {}]   ;;  %s1091_s2 = inlined_call_operand.hbm [shape: f32[16,128], index: 2, kind: input, shape index: {}]   ;;  %s1092_s3 = inlined_call_operand.hbm [shape: f32[16,128], index: 3, kind: input, shape index: {}]   ;;  %s1093_s4 = inlined_call_operand.hbm [shape: f32[2,8,128], index: 4, kind: output, shape index: {0}]   ;;  %s1094_s5 = inlined_call_operand.hbm [shape: f32[2,8,128], index: 5, kind: output, shape index: {1}]  }
   0x1   :  { %1099 = sst [smem:[#allocation18_spill]] %s1090_s1 }
   0x2   :  { %1100 = sst [smem:[#allocation19_spill]] %s1091_s2 }
   0x3   :  { %11 = sst [smem:[#allocation2]] %s1089_s0 }
   0x4   :  { %12 = vsyncpa [#allocation4], 0 }
   0x5   :  { %14 = vsyncpa [#allocation4 + $0x1], 0 }
   0x6   :  { %15 = vsyncpa [#allocation7], 0 }
   0x7   :  { %17 = vsyncpa [#allocation7 + $0x1], 0 }
   0x8   :  { %18 = vsyncpa [#allocation5], 0 }
   0x9   :  { %20 = vsyncpa [#allocation5 + $0x1], 0 }
   0xa   :  { %21 = vsyncpa [#allocation11], 0 }
   0xb   :  { %23 = vsyncpa [#allocation11 + $0x1], 0  ;;  %s839_s20 = smov 0   ;;  %s841_s21 = smov 0  }
   0xc   :  { %s843_s22 = smov 0   ;;  %s845_s23 = smov 0  }
   0xd LB: > { %1101 = sst [smem:[#allocation16_spill]] %s795_s22  ;;  %s860_s0 = sadd.s32 4294967295, %s799_s23   ;;  %s799_s23 = sphi %s845_s23, %s1122_s23   ;;  %s795_s22 = sphi %s843_s22, %s1119_s22   ;;  %s791_s21 = sphi %s841_s21, %s1121_s21   ;;  %s787_s20 = sphi %s839_s20, %s1120_s20  }
   0xe   : > { %s531_s24 = sadd.s32 4294967294, %s799_s23   ;;  %s864_s25 = sadd.s32 1, %s799_s23  }
   0xf   : > { %s57_s26 = sadd.s32 1, %s795_s22  ;;  %s54_s27 = ssub.s32 %s799_s23, %s864_s25 }
  0x10   : > { %p64_p0 = scmp.ne.s32.totalorder %s795_s22, %s791_s21  ;;  %p55_p1 = scmp.eq.s32.totalorder %s54_s27, 0 }
  0x11   : > { %p65_p2 = scmp.eq.s32.totalorder %s799_s23, 0  ;;  %p70_p3 = scmp.ne.s32.totalorder %s791_s21, %s787_s20 }
  0x12   : > { %p71_p4 = scmp.eq.s32.totalorder %s860_s0, 0  ;;  %p146_p7 = scmp.eq.s32.totalorder %s860_s0, 1 }
  0x13   : > { %s876_s28 = scalar_select %p55_p1, %s795_s22, %s57_s26  }
  0x14   : > { %p66_p5 = por %p65_p2, %p64_p0  ;;  %p878_p6 = por %p71_p4, %p70_p3 }
  0x15   : > { %1102 = sst [smem:[#allocation17_spill]] %s876_s28  ;;  %p152_p8 = scmp.eq.s32.totalorder %s531_s24, 1 }
  0x16   : > { %s1103_s29 = scalar_select %p878_p6, 1, 0 }
  0x17   : > { %p583_p10 = scmp.lt.s32.totalorder %s799_s23, 2  ;;  %p885_p11 = por %p146_p7, %p64_p0 }
  0x18   : > { %p889_p12 = por %p152_p8, %p70_p3  ;;  %s1095_s7 = sand.u32 1, %s795_s22  }
  0x19   : > { %s1104_s30 = scalar_select %p885_p11, 1, 0 }
  0x1a   : > { %s1105_s6 = scalar_select %p889_p12, 1, 0 }
  0x1b   : > { %s895_s8 = sshll.u32 %s799_s23, 7  ;;  %s899_s9 = sshll.u32 %s1095_s7, 3 }
  0x1c   : > { %p901_p13 = pnand %p583_p10, %p66_p5  ;;  %s219_s11 = sand.u32 1, %s799_s23  }
  0x1d   : > { %s1107_s2 = sld [smem:[#allocation19_spill]]  ;;  %s223_s15 = scalar_lea.vmem [#allocation6], %s899_s9 }
  0x1e   : > { %s230_s16 = sshll.u32 %s223_s15, 4  ;;  %s914_s17 = scalar_lea.sflag [#allocation7], %s219_s11  ;;  %s231_s16 = int_to_ptr.vmem [resolvable:$true] %s230_s16 }
  0x1f   : > { %p920_p2 = pneg %p901_p13 }
  0x23   : > { %s910_s14 = scalar_lea.hbm %s1107_s2, %s895_s8  ;;  %s622_s27 = scalar_lea.hbm %s1107_s2, 256 }
  0x24   : > { %s617_s18 = scalar_lea.hbm %s910_s14, 128  ;;  %p623_p5 = scmp.lt.s32.totalorder %s910_s14, %s1107_s2 }
  0x25   : > { %p618_p1 = scmp.ne.s32.totalorder %s910_s14, %s617_s18  ;;  %p624_p7 = scmp.lt.s32.totalorder %s622_s27, %s617_s18 }
  0x27   : > { %p620_p3 = pnand %p920_p2, %p618_p1  ;;  %p625_p8 = por %p624_p7, %p623_p5 }
  0x29   : > { %p621_p4 = pneg %p620_p3 }
  0x2b   : > { %p626_p10 = pnand %p625_p8, %p621_p4 }
  0x2d   : > { %629 = shalt.err (!%p626_p10)
}
  0x2e   : > { %s630_s11 = scalar_lea.vmem %s231_s16, 128  ;;  %s801_s15 = smov [#allocation6]  }
  0x2f   : > { %p631_p9 = scmp.ne.s32.totalorder %s231_s16, %s630_s11  ;;  %s635_s7 = sshll.u32 %s801_s15, 4  ;;  %s636_s7 = int_to_ptr.vmem [resolvable:$false] %s635_s7 }
  0x30   : > { %s637_s28 = scalar_lea.vmem %s636_s7, 256  ;;  %p638_p1 = scmp.lt.s32.totalorder %s231_s16, %s636_s7 }
  0x31   : > { %p633_p0 = pnand %p631_p9, %p920_p2  ;;  %p639_p3 = scmp.lt.s32.totalorder %s637_s28, %s630_s11 }
  0x33   : > { %p634_p12 = pneg %p633_p0  ;;  %p640_p11 = por %p639_p3, %p638_p1 }
  0x35   : > { %p641_p6 = pnand %p640_p11, %p634_p12 }
  0x37   : > { %644 = shalt.err (!%p641_p6)
}
  0x38   : > { %572 = dma.hbm_to_vmem [thread:$0]  (!%p901_p13), %s910_s14, 128, %s231_s16, %s914_s17  }
  0x39   : > { %p253_p9 = scmp.lt.s32.totalorder %s799_s23, 3  ;;  %s1109_s1 = sld [smem:[#allocation18_spill]] }
  0x3a   : > { %p1110_p0 = scmp.ge.s32.totalorder %s799_s23, 1  ;;  %s205_s26 = scalar_lea.vmem [#allocation3], %s899_s9 }
  0x3b   : > { %s212_s27 = sshll.u32 %s205_s26, 4  ;;  %s1112_s12 = sand.u32 1, %s795_s22   ;;  %s213_s27 = int_to_ptr.vmem [resolvable:$true] %s212_s27 }
  0x3c   : > { %p948_p6 = pnand %p1110_p0, %p253_p9  ;;  %s202_s13 = scalar_lea.sflag [#allocation4], %s1112_s12 }
  0x3e   : > { %s1111_s28 = scalar_select %p948_p6, 1, 0 }
  0x3f   : > { %s944_s7 = scalar_lea.hbm %s1109_s1, %s895_s8  ;;  %s650_s15 = scalar_lea.hbm %s1109_s1, 256 }
  0x40   : > { %s645_s14 = scalar_lea.hbm %s944_s7, 128  ;;  %p651_p5 = scmp.lt.s32.totalorder %s944_s7, %s1109_s1 }
  0x41   : > { %p646_p11 = scmp.ne.s32.totalorder %s944_s7, %s645_s14  ;;  %p652_p7 = scmp.lt.s32.totalorder %s650_s15, %s645_s14 }
  0x43   : > { %p648_p12 = pnand %p646_p11, %p920_p2  ;;  %p653_p8 = por %p652_p7, %p651_p5 }
  0x45   : > { %p649_p4 = pneg %p648_p12 }
  0x47   : > { %p654_p10 = pnand %p653_p8, %p649_p4 }
  0x49   : > { %657 = shalt.err (!%p654_p10)
}
  0x4a   : > { %s658_s26 = scalar_lea.vmem %s213_s27, 128  ;;  %s802_s12 = smov [#allocation3]  }
  0x4b   : > { %p659_p1 = scmp.ne.s32.totalorder %s213_s27, %s658_s26  ;;  %s663_s2 = sshll.u32 %s802_s12, 4  ;;  %s664_s2 = int_to_ptr.vmem [resolvable:$false] %s663_s2 }
  0x4c   : > { %s665_s22 = scalar_lea.vmem %s664_s2, 256  ;;  %p666_p0 = scmp.lt.s32.totalorder %s213_s27, %s664_s2 }
  0x4d   : > { %p661_p3 = pnand %p659_p1, %p920_p2  ;;  %p667_p11 = scmp.lt.s32.totalorder %s665_s22, %s658_s26 }
  0x4f   : > { %p662_p9 = pneg %p661_p3  ;;  %p668_p12 = por %p667_p11, %p666_p0 }
  0x51   : > { %p669_p6 = pnand %p668_p12, %p662_p9 }
  0x53   : > { %672 = shalt.err (!%p669_p6)
}
  0x54   : > { %569 = dma.hbm_to_vmem [thread:$0]  (!%p901_p13), %s944_s7, 128, %s213_s27, %s202_s13  }
  0x55   : > { %s246_s11 = scalar_lea.hbm %s1092_s3, %s895_s8  ;;  %s241_s15 = scalar_lea.vmem [#allocation8], %s899_s9 }
  0x56   : > { %s248_s18 = sshll.u32 %s241_s15, 4  ;;  %s673_s24 = scalar_lea.hbm %s246_s11, 128  ;;  %s249_s18 = int_to_ptr.vmem [resolvable:$true] %s248_s18 }
  0x57   : > { %p674_p4 = scmp.ne.s32.totalorder %s246_s11, %s673_s24  ;;  %s678_s26 = scalar_lea.hbm %s1092_s3, 256 }
  0x58   : > { %p679_p6 = scmp.lt.s32.totalorder %s246_s11, %s1092_s3  ;;  %p680_p8 = scmp.lt.s32.totalorder %s678_s26, %s673_s24 }
  0x59   : > { %p676_p5 = pnand %p674_p4, %p920_p2 }
  0x5a   : > { %p681_p10 = por %p680_p8, %p679_p6 }
  0x5b   : > { %p677_p7 = pneg %p676_p5 }
  0x5d   : > { %p682_p1 = pnand %p681_p10, %p677_p7 }
  0x5f   : > { %685 = shalt.err (!%p682_p1)
}
  0x60   : > { %s686_s8 = scalar_lea.vmem %s249_s18, 128  ;;  %s803_s9 = smov [#allocation8]  }
  0x61   : > { %p687_p3 = scmp.ne.s32.totalorder %s249_s18, %s686_s8  ;;  %s691_s7 = sshll.u32 %s803_s9, 4  ;;  %s692_s7 = int_to_ptr.vmem [resolvable:$false] %s691_s7 }
  0x62   : > { %s693_s27 = scalar_lea.vmem %s692_s7, 256  ;;  %p694_p11 = scmp.lt.s32.totalorder %s249_s18, %s692_s7 }
  0x63   : > { %p689_p9 = pnand %p687_p3, %p920_p2  ;;  %p695_p12 = scmp.lt.s32.totalorder %s693_s27, %s686_s8 }
  0x65   : > { %p690_p0 = pneg %p689_p9  ;;  %p696_p4 = por %p695_p12, %p694_p11 }
  0x67   : > { %p697_p5 = pnand %p696_p4, %p690_p0 }
  0x69   : > { %700 = shalt.err (!%p697_p5)
}
  0x6a   : > { %575 = dma.hbm_to_vmem [thread:$0]  (!%p901_p13), %s246_s11, 128, %s249_s18, %s914_s17  }
  0x6b   : > { %p1113_p7 = scmp.ne.s32.totalorder %s1111_s28, 0 }
  0x6c   : > { %s992_s1 = sand.u32 (!%p1113_p7), 1, %s791_s21   ;;  %p1114_p2 = scmp.ne.s32.totalorder (!%p1113_p7), %s1103_s29, 0 }
  0x6d   : > { %257 = sbr.rel (%p1113_p7) target bundleno = 368 (0x170), region = 36  ;;  %s995_s19 = sshll.u32 (!%p1113_p7), %s992_s1, 3 }
  0x6e   : > { %s260_s13 = scalar_lea.sflag (!%p1113_p7), [#allocation4], %s992_s1  ;;  %s263_s14 = scalar_lea.vmem (!%p1113_p7), [#allocation3], %s995_s19 }
  0x72   : > { %770 = dma.done.wait (%p1114_p2), %s260_s13, 128  }
  0x73   : > { %772 = vsyncadd (%p1114_p2), %s260_s13, 4294967168  ;;  %s268_s10 = sand.u32 1, %s860_s0   ;;  %s272_s28 = scalar_lea.vmem [#allocation6], %s995_s19 }
  0x74   : > { %s269_s17 = scalar_lea.sflag [#allocation7], %s268_s10 }
  0x75   : > { %774 = dma.done.wait (%p1114_p2), %s269_s17, 256  }
  0x76   : > { %776 = vsyncadd (%p1114_p2), %s269_s17, 4294967040  ;;  %s323_s16 = sld [smem:[#allocation2]]  ;;  %v324_v0 = vld [vmem:[%s263_s14] sm:$0xff]  ;;  %v325_v1 = vld [vmem:[%s272_s28] sm:$0xff]  ;;  %s281_s11 = scalar_lea.vmem [#allocation8], %s995_s19 }
  0x77   : > { %v327_v3 = vsub.f32 %v325_v1, %v324_v0  ;;  %v326_v5 = vld [vmem:[%s281_s11] sm:$0xff]  ;;  %s548_s29 = sshll.u32 %s860_s0, 7  ;;  %s315_s15 = scalar_lea.vmem [#allocation9], %s995_s19 }
  0x78   : > { %s373_s18 = sshll.u32 %s315_s15, 4  ;;  %s322_s24 = scalar_lea.vmem [#allocation10], %s995_s19  ;;  %s1022_s18 = int_to_ptr.vmem [resolvable:$true] %s373_s18 }
  0x79   : > { %s386_s2 = sshll.u32 %s322_s24, 4  ;;  %s1020_s12 = scalar_lea.hbm %s1093_s4, %s548_s29  ;;  %s1024_s2 = int_to_ptr.vmem [resolvable:$true] %s386_s2 }
  0x7a   : > { %s355_s9 = scalar_lea.sflag [#allocation5], %s992_s1  ;;  %s701_s7 = scalar_lea.vmem %s1022_s18, 128 }
  0x7b   : > { %p702_p13 = scmp.ne.s32.totalorder %s1022_s18, %s701_s7  ;;  %p1115_p6 = scmp.ne.s32.totalorder %s1104_s30, 0 }
  0x7c   : > { %v328_v2 = vstv %s323_s16  ;;  %s804_s27 = smov [#allocation9]  }
  0x7d   : > { %v329_v4 = vadd.f32 %v328_v2, %v327_v3  ;;  %p703_p8 = pnand %p702_p13, %p1115_p6  ;;  %s705_s13 = sshll.u32 %s804_s27, 4  ;;  %s706_s13 = int_to_ptr.vmem [resolvable:$false] %s705_s13 }
  0x7e   : > { %s707_s14 = scalar_lea.vmem %s706_s13, 256  ;;  %p708_p1 = scmp.lt.s32.totalorder %s1022_s18, %s706_s13 }
  0x7f   : > { %v330_v6 = vmax.f32 %v329_v4, 0.0  ;;  %p704_p10 = pneg %p703_p8  ;;  %p709_p3 = scmp.lt.s32.totalorder %s707_s14, %s701_s7 }
  0x81   : > { %v331_v7 = vmul.f32 %v330_v6, %v326_v5  ;;  %p710_p9 = por %p709_p3, %p708_p1 }
  0x83   : > { %332 = vadd.xlane.f32.xlu0 %v331_v7  ;;  %p711_p0 = pnand %p710_p9, %p704_p10 }
  0x87   : > { %343 = vadd.xlane.f32.xlu0 %v326_v5 }
 0x10c   : > { %v333_v8 = vpop.xlane.xlu0 %332 }
 0x10d   : > { %v334_v9 = vrot.slane %v333_v8, 4 }
 0x10f   : > { %v335_v10 = vadd.f32 %v334_v9, %v333_v8 }
 0x110   : > { %v344_v11 = vpop.xlane.xlu0 %343 }
 0x111   : > { %v336_v12 = vrot.slane %v335_v10, 2  ;;  %v345_v13 = vrot.slane %v344_v11, 4 }
 0x113   : > { %v346_v14 = vadd.f32 %v345_v13, %v344_v11  ;;  %v337_v15 = vadd.f32 %v336_v12, %v335_v10 }
 0x115   : > { %v347_v16 = vrot.slane %v346_v14, 2  ;;  %v338_v17 = vrot.slane %v337_v15, 1 }
 0x117   : > { %v348_v18 = vadd.f32 %v347_v16, %v346_v14  ;;  %v339_v19 = vadd.f32 %v338_v17, %v337_v15 }
 0x119   : > { %552 = vpush %v339_v19  ;;  %v349_v20 = vrot.slane %v348_v18, 1 }
 0x11b   : > { %v350_v21 = vadd.f32 %v349_v20, %v348_v18 }
 0x11d   : > { %554 = vpush %v350_v21 }
 0x14a   : > { %s553_s8 = spop %552 }
 0x14b   : > { %v341_v22 = vstv %s553_s8 }
 0x14c   : > { %342 = vst [vmem:[%s315_s15] sm:$0xff] %v341_v22 }
 0x14d   : > { %714 = shalt.err (!%p711_p0)
}
 0x14e   : > { %s715_s10 = scalar_lea.hbm %s1020_s12, 128  ;;  %s719_s16 = scalar_lea.hbm %s1093_s4, 256 }
 0x14f   : > { %p716_p11 = scmp.ne.s32.totalorder %s1020_s12, %s715_s10  ;;  %p720_p5 = scmp.lt.s32.totalorder %s1020_s12, %s1093_s4 }
 0x150   : > { %p721_p7 = scmp.lt.s32.totalorder %s719_s16, %s715_s10 }
 0x151   : > { %p717_p12 = pnand %p716_p11, %p1115_p6 }
 0x152   : > { %p722_p2 = por %p721_p7, %p720_p5 }
 0x153   : > { %p718_p4 = pneg %p717_p12 }
 0x155   : > { %p723_p13 = pnand %p722_p2, %p718_p4 }
 0x157   : > { %726 = shalt.err (!%p723_p13)
}
 0x158   : > { %562 = dma.vmem_to_hbm [thread:$0]  (%p1115_p6), %s1022_s18, 128, %s1020_s12, %s355_s9  }
 0x159   : > { %s555_s22 = spop %554  ;;  %s384_s7 = scalar_lea.hbm %s1094_s5, %s548_s29 }
 0x15a   : > { %v352_v23 = vstv %s555_s22  ;;  %s360_s27 = scalar_lea.sflag [#allocation11], %s992_s1  ;;  %s727_s13 = scalar_lea.vmem %s1024_s2, 128 }
 0x15b   : > { %353 = vst [vmem:[%s322_s24] sm:$0xff] %v352_v23  ;;  %p728_p8 = scmp.ne.s32.totalorder %s1024_s2, %s727_s13  ;;  %s805_s14 = smov [#allocation10]  }
 0x15c   : > { %s731_s10 = sshll.u32 %s805_s14, 4  ;;  %s732_s10 = int_to_ptr.vmem [resolvable:$false] %s731_s10 }
 0x15d   : > { %p729_p10 = pnand %p728_p8, %p1115_p6  ;;  %s733_s17 = scalar_lea.vmem %s732_s10, 256 }
 0x15e   : > { %p734_p3 = scmp.lt.s32.totalorder %s1024_s2, %s732_s10  ;;  %p735_p9 = scmp.lt.s32.totalorder %s733_s17, %s727_s13 }
 0x15f   : > { %p730_p1 = pneg %p729_p10 }
 0x160   : > { %p736_p0 = por %p735_p9, %p734_p3 }
 0x162   : > { %p737_p11 = pnand %p736_p0, %p730_p1 }
 0x164   : > { %740 = shalt.err (!%p737_p11)
}
 0x165   : > { %s741_s0 = scalar_lea.hbm %s384_s7, 128  ;;  %s745_s29 = scalar_lea.hbm %s1094_s5, 256 }
 0x166   : > { %p742_p12 = scmp.ne.s32.totalorder %s384_s7, %s741_s0  ;;  %p746_p7 = scmp.lt.s32.totalorder %s384_s7, %s1094_s5 }
 0x167   : > { %p747_p2 = scmp.lt.s32.totalorder %s745_s29, %s741_s0 }
 0x168   : > { %p743_p4 = pnand %p742_p12, %p1115_p6 }
 0x169   : > { %p748_p13 = por %p747_p2, %p746_p7 }
 0x16a   : > { %p744_p5 = pneg %p743_p4 }
 0x16c   : > { %p749_p8 = pnand %p748_p13, %p744_p5 }
 0x16e   : > { %752 = shalt.err (!%p749_p8)
}
 0x16f   : > { %563 = dma.vmem_to_hbm [thread:$0]  (%p1115_p6), %s1024_s2, 128, %s384_s7, %s360_s27  }
 0x170 PF: > { %s398_s12 = sand.u32 1, %s787_s20   ;;  %p1116_p10 = scmp.ne.s32.totalorder %s1105_s6, 0 }
 0x171   : > { %p1117_p1 = scmp.ge.s32.totalorder %s799_s23, 2  ;;  %s399_s9 = scalar_lea.sflag [#allocation5], %s398_s12 }
 0x173   : > { %p577_p3 = pnand %p1117_p1, %p1116_p10 }
 0x175   : > { %p578_p9 = pneg %p577_p3 }
 0x177   : > { %778 = dma.done.wait (%p578_p9), %s399_s9, 128  }
 0x178   : > { %780 = vsyncadd (%p578_p9), %s399_s9, 4294967168  ;;  %s408_s28 = scalar_lea.sflag [#allocation11], %s398_s12 }
 0x179   : > { %782 = dma.done.wait (%p578_p9), %s408_s28, 128  }
 0x17a   : > { %784 = vsyncadd (%p578_p9), %s408_s28, 4294967168  ;;  %s1118_s30 = sld [smem:[#allocation16_spill]]  ;;  %p26_p6 = scmp.ge.s32.totalorder %s864_s25, 4  }
 0x17b   : > { %s1119_s22 = sld [smem:[#allocation17_spill]]  ;;  %s1120_s20 = smov %s791_s21 }
 0x17c   : > { %s1122_s23 = smov %s864_s25  ;;  %28 = sbr.rel (!%p26_p6) target bundleno = 13 (0xd), region = 122 }
 0x180   : > { %s1121_s21 = smov %s1118_s30 }
 0x181   :  { %413 = vsyncpa [#allocation4], 1 }
 0x182   :  { %415 = vsyncpa [#allocation4 + $0x1], 1 }
 0x183   :  { %416 = vsyncpa [#allocation7], 1 }
 0x184   :  { %418 = vsyncpa [#allocation7 + $0x1], 1 }
 0x185   :  { %419 = vsyncpa [#allocation5], 1 }
 0x186   :  { %421 = vsyncpa [#allocation5 + $0x1], 1 }
 0x187   :  { %422 = vsyncpa [#allocation11], 1 }
 0x188   :  { %424 = vsyncpa [#allocation11 + $0x1], 1 }

</bundles_post_ra>
